<compile_context>
chip_gen: v7x
topology: tpu7x:2x2x1
jax: 0.10.0
libtpu: 0.0.40
codegen_flags: <defaults>
</compile_context>

<pallas_src>
import jax
import jax.numpy as jnp
from jax.experimental import pallas as pl
from jax.experimental.pallas import tpu as pltpu

_HPAD = 128  # hidden dim 100 padded to a full lane width


def _image_net_kernel(x_ref, w1x_ref, y_ref, w1y_ref, w2_ref, w3_ref, o_ref):
    # fc1x: the only real matmul -> MXU, bf16 operands, f32 accumulation.
    hx = jnp.maximum(
        jnp.dot(x_ref[...], w1x_ref[...], preferred_element_type=jnp.float32),
        0.0)                                                   # (TB, 2) f32

    # fc1y: y_dim == 1 -> pure broadcast multiply on the VPU (no MXU pass).
    hy = jnp.maximum(y_ref[...] * w1y_ref[...], 0.0)           # (TB,1)*(1,2)->(TB,2)

    # fc2 with the concat folded away algebraically:
    #   cat([hx, hy], 1) @ W2^T
    #     == hx[:,0]*W2t[0,:] + hx[:,1]*W2t[1,:] + hy[:,0]*W2t[2,:] + hy[:,1]*W2t[3,:]
    # K=4 matmuls are pure MXU padding, so do it as 4 VPU FMAs over a
    # lane-dense (TB, 128) slab (columns 100..127 of W2t are zero).
    w2 = w2_ref[...]                                           # (4, 128)
    h2 = (hx[:, 0:1] * w2[0:1, :] + hx[:, 1:2] * w2[1:2, :]
          + hy[:, 0:1] * w2[2:3, :] + hy[:, 1:2] * w2[3:4, :])  # (TB, 128)
    h2 = jnp.maximum(h2, 0.0)

    # fc3: N == 1 -> lane reduction instead of an MXU pass.  Padded lanes of
    # w3 are zero, so they contribute nothing to the sum.
    out = jnp.sum(h2 * w3_ref[...], axis=-1, keepdims=True)    # (TB, 128)->(TB, 1)
    o_ref[...] = out.astype(o_ref.dtype)


def image_network_forward(x, y, params, *, tb=None):
    """x: (B, x_dim) f32, y: (B, y_dim=1) f32. Returns (B, 1) f32."""
    w1x, w1y, w2, w3 = params["w1x"], params["w1y"], params["w2"], params["w3"]
    B, x_dim = x.shape
    y_dim = y.shape[1]
    hidden = w2.shape[0]       # 100
    assert w3.shape == (1, hidden)

    if tb is None:
        # Fewer, bigger tiles amortize the ~0.35 us per-step overhead and get
        # closer to the HBM roofline; 4096 keeps double-buffered bf16 x well
        # inside v7x's 64 MiB-per-TC VMEM for typical x_dim.
        tb = B if B <= 4096 else 4096
    assert B % tb == 0, "batch must be a multiple of the batch tile"
    assert tb == B or tb % 8 == 0, "partial batch tiles must be sublane (8) aligned"

    # --- weight / input prep (glue, not hot path) ---------------------------
    # bf16 on the dominant DMA path (x and W1x^T); f32 accumulation in-kernel.
    x_bf16 = x.astype(jnp.bfloat16)
    w1x_t = w1x.T.astype(jnp.bfloat16)            # (x_dim, 2) bf16
    w1y_t = w1y.T.astype(jnp.float32)             # (1, 2)
    # Zero-pad the 100-wide hidden dim to 128 lanes (lane-dense epilogue).
    w2_t = jnp.zeros((4, _HPAD), jnp.float32).at[:, :hidden].set(w2.T)   # (4, 128)
    w3_p = jnp.zeros((1, _HPAD), jnp.float32).at[:, :hidden].set(w3)     # (1, 128)

    grid = (B // tb,)

    # Conservative explicit scoped-VMEM budget: double-buffered x tile plus
    # resident weights plus f32 temporaries, with 2x headroom, clamped to
    # 48 MiB so it also fits v7x (64 MiB physical per TC).
    itemsize_x = jnp.dtype(jnp.bfloat16).itemsize
    needed = (2 * tb * x_dim * itemsize_x          # double-buffered x tile
              + 2 * tb * (y_dim + 1) * 4           # y tile + out tile (dbl buf)
              + (x_dim * 2) * itemsize_x           # resident W1x^T
              + (4 + 1 + 1) * _HPAD * 4            # resident W2^T, W3, w1y
              + 8 * tb * _HPAD * 4)                # f32 temporaries (h2 etc.)
    vmem_limit = max(32 << 20, min(48 << 20, 2 * needed))

    return pl.pallas_call(
        _image_net_kernel,
        out_shape=jax.ShapeDtypeStruct((B, 1), jnp.float32),
        grid_spec=pl.GridSpec(
            grid=grid,
            in_specs=[
                pl.BlockSpec((tb, x_dim), lambda i: (i, 0)),    # x batch tile (bf16)
                pl.BlockSpec((x_dim, 2), lambda i: (0, 0)),     # W1x^T (full, bf16)
                pl.BlockSpec((tb, y_dim), lambda i: (i, 0)),    # y batch tile
                pl.BlockSpec((y_dim, 2), lambda i: (0, 0)),     # W1y^T (full)
                pl.BlockSpec((4, _HPAD), lambda i: (0, 0)),     # W2^T (lane-padded)
                pl.BlockSpec((1, _HPAD), lambda i: (0, 0)),     # W3 row (lane-padded)
            ],
            out_specs=pl.BlockSpec((tb, 1), lambda i: (i, 0)),
        ),
        compiler_params=pltpu.CompilerParams(
            dimension_semantics=("parallel",),    # independent batch tiles
            vmem_limit_bytes=int(vmem_limit)),
    )(x_bf16, w1x_t, y, w1y_t, w2_t, w3_p)


def init_params(key, x_dim, y_dim):
    """Deterministic synthetic weights matching nn.Linear(..., bias=False)."""
    k1, k2, k3, k4 = jax.random.split(key, 4)

    def lin(k, out_f, in_f):
        # Uniform(-1/sqrt(in_f), 1/sqrt(in_f)), like torch default init.
        bound = 1.0 / jnp.sqrt(jnp.float32(in_f))
        return jax.random.uniform(k, (out_f, in_f), jnp.float32, -bound, bound)

    return {
        "w1x": lin(k1, 2, x_dim),     # fc1x.weight
        "w1y": lin(k2, 2, y_dim),     # fc1y.weight
        "w2":  lin(k3, 100, 4),       # fc2.weight
        "w3":  lin(k4, 1, 100),       # fc3.weight
    }


def reference_forward(x, y, p, *, bf16_fc1x=False):
    """Pure-JAX reference.  With bf16_fc1x=True the fc1x contraction uses the
    same bf16-input / f32-accumulate recipe as the kernel."""
    if bf16_fc1x:
        hx = jnp.dot(x.astype(jnp.bfloat16), p["w1x"].T.astype(jnp.bfloat16),
                     preferred_element_type=jnp.float32)
    else:
        hx = x @ p["w1x"].T
    hx = jnp.maximum(hx, 0.0)
    hy = jnp.maximum(y @ p["w1y"].T, 0.0)
    h = jnp.concatenate([hx, hy], axis=1)
    h = jnp.maximum(h @ p["w2"].T, 0.0)
    return h @ p["w3"].T


if __name__ == "__main__":
    # Small shapes consistent with the module: x is a flattened image vector,
    # y is a scalar per example.  B=16 with tb=8 exercises the batch-parallel
    # grid (2 steps) while staying tiny.
    B, X_DIM, Y_DIM = 16, 512, 1

    key = jax.random.PRNGKey(0)
    kx, ky, kp = jax.random.split(key, 3)
    x = jax.random.normal(kx, (B, X_DIM), jnp.float32)
    y = jax.random.normal(ky, (B, Y_DIM), jnp.float32)
    params = init_params(kp, X_DIM, Y_DIM)

    out = image_network_forward(x, y, params, tb=8)
    out = jax.block_until_ready(out)
    assert out.shape == (B, 1)

    # Tight check vs a reference using the same bf16 fc1x contraction.
    ref_bf16 = reference_forward(x, y, params, bf16_fc1x=True)
    assert jnp.allclose(out, ref_bf16, atol=1e-3, rtol=1e-3), \
        "mismatch vs bf16-matched reference"

    # Loose sanity check vs the full-f32 reference (bf16 x costs ~1e-2 rel).
    ref_f32 = reference_forward(x, y, params, bf16_fc1x=False)
    assert jnp.allclose(out, ref_f32, atol=3e-2, rtol=3e-2), \
        "mismatch vs f32 reference beyond bf16 tolerance"

    print("KERNEL_OK")
</pallas_src>

<mosaic_0001>
module attributes {stable_mosaic.version = 11 : i64} {
  func.func @_image_net_kernel(%arg0: i32, %arg1: memref<8x512xbf16, #tpu.memory_space<vmem>>, %arg2: memref<512x2xbf16, #tpu.memory_space<vmem>>, %arg3: memref<8x1xf32, #tpu.memory_space<vmem>>, %arg4: memref<1x2xf32, #tpu.memory_space<vmem>>, %arg5: memref<4x128xf32, #tpu.memory_space<vmem>>, %arg6: memref<1x128xf32, #tpu.memory_space<vmem>>, %arg7: memref<8x1xf32, #tpu.memory_space<vmem>>) attributes {dimension_semantics = [#tpu.dimension_semantics<parallel>], iteration_bounds = array<i64: 2>, scalar_prefetch = 0 : i64, scratch_operands = 0 : i64, tpu.core_type = #tpu.core_type<tc>, window_params = [{transform_indices = @transform_0, window_bounds = array<i64: 8, 512>}, {pipeline_mode = #tpu.pipeline_mode<synchronous>, transform_indices = @transform_1, window_bounds = array<i64: 512, 2>}, {transform_indices = @transform_2, window_bounds = array<i64: 8, 1>}, {pipeline_mode = #tpu.pipeline_mode<synchronous>, transform_indices = @transform_3, window_bounds = array<i64: 1, 2>}, {pipeline_mode = #tpu.pipeline_mode<synchronous>, transform_indices = @transform_4, window_bounds = array<i64: 4, 128>}, {pipeline_mode = #tpu.pipeline_mode<synchronous>, transform_indices = @transform_5, window_bounds = array<i64: 1, 128>}, {transform_indices = @transform_6, window_bounds = array<i64: 8, 1>}]} {
    %c0 = arith.constant 0 : index
    %c0_0 = arith.constant 0 : index
    %0 = vector.load %arg1[%c0, %c0_0] : memref<8x512xbf16, #tpu.memory_space<vmem>>, vector<8x512xbf16>
    %c0_1 = arith.constant 0 : index
    %c0_2 = arith.constant 0 : index
    %1 = vector.load %arg2[%c0_1, %c0_2] : memref<512x2xbf16, #tpu.memory_space<vmem>>, vector<512x2xbf16>
    %cst = arith.constant dense<0.000000e+00> : vector<8x2xf32>
    %2 = tpu.matmul %0, %1, %cst {dimension_numbers = #tpu.dot_dimension_numbers<[1], [0], [0], [1], [0, 0, 1, 1], [], []>} : vector<8x512xbf16>, vector<512x2xbf16>, vector<8x2xf32> -> vector<8x2xf32>
    %cst_3 = arith.constant 0.000000e+00 : f32
    %3 = vector.broadcast %cst_3 : f32 to vector<8x2xf32>
    %4 = arith.maximumf %2, %3 : vector<8x2xf32>
    %c0_4 = arith.constant 0 : index
    %c0_5 = arith.constant 0 : index
    %5 = vector.load %arg3[%c0_4, %c0_5] : memref<8x1xf32, #tpu.memory_space<vmem>>, vector<8x1xf32>
    %c0_6 = arith.constant 0 : index
    %c0_7 = arith.constant 0 : index
    %6 = vector.load %arg4[%c0_6, %c0_7] : memref<1x2xf32, #tpu.memory_space<vmem>>, vector<1x2xf32>
    %7 = vector.broadcast %5 : vector<8x1xf32> to vector<8x2xf32>
    %8 = vector.broadcast %6 : vector<1x2xf32> to vector<8x2xf32>
    %9 = arith.mulf %7, %8 : vector<8x2xf32>
    %cst_8 = arith.constant 0.000000e+00 : f32
    %10 = vector.broadcast %cst_8 : f32 to vector<8x2xf32>
    %11 = arith.maximumf %9, %10 : vector<8x2xf32>
    %c0_9 = arith.constant 0 : index
    %c0_10 = arith.constant 0 : index
    %12 = vector.load %arg5[%c0_9, %c0_10] : memref<4x128xf32, #tpu.memory_space<vmem>>, vector<4x128xf32>
    %13 = vector.extract_strided_slice %4 {offsets = [0, 0], sizes = [8, 1], strides = [1, 1]} : vector<8x2xf32> to vector<8x1xf32>
    %14 = vector.extract_strided_slice %12 {offsets = [0, 0], sizes = [1, 128], strides = [1, 1]} : vector<4x128xf32> to vector<1x128xf32>
    %15 = vector.broadcast %13 : vector<8x1xf32> to vector<8x128xf32>
    %16 = vector.broadcast %14 : vector<1x128xf32> to vector<8x128xf32>
    %17 = arith.mulf %15, %16 : vector<8x128xf32>
    %18 = vector.extract_strided_slice %4 {offsets = [0, 1], sizes = [8, 1], strides = [1, 1]} : vector<8x2xf32> to vector<8x1xf32>
    %19 = vector.extract_strided_slice %12 {offsets = [1, 0], sizes = [1, 128], strides = [1, 1]} : vector<4x128xf32> to vector<1x128xf32>
    %20 = vector.broadcast %18 : vector<8x1xf32> to vector<8x128xf32>
    %21 = vector.broadcast %19 : vector<1x128xf32> to vector<8x128xf32>
    %22 = arith.mulf %20, %21 : vector<8x128xf32>
    %23 = arith.addf %17, %22 : vector<8x128xf32>
    %24 = vector.extract_strided_slice %11 {offsets = [0, 0], sizes = [8, 1], strides = [1, 1]} : vector<8x2xf32> to vector<8x1xf32>
    %25 = vector.extract_strided_slice %12 {offsets = [2, 0], sizes = [1, 128], strides = [1, 1]} : vector<4x128xf32> to vector<1x128xf32>
    %26 = vector.broadcast %24 : vector<8x1xf32> to vector<8x128xf32>
    %27 = vector.broadcast %25 : vector<1x128xf32> to vector<8x128xf32>
    %28 = arith.mulf %26, %27 : vector<8x128xf32>
    %29 = arith.addf %23, %28 : vector<8x128xf32>
    %30 = vector.extract_strided_slice %11 {offsets = [0, 1], sizes = [8, 1], strides = [1, 1]} : vector<8x2xf32> to vector<8x1xf32>
    %31 = vector.extract_strided_slice %12 {offsets = [3, 0], sizes = [1, 128], strides = [1, 1]} : vector<4x128xf32> to vector<1x128xf32>
    %32 = vector.broadcast %30 : vector<8x1xf32> to vector<8x128xf32>
    %33 = vector.broadcast %31 : vector<1x128xf32> to vector<8x128xf32>
    %34 = arith.mulf %32, %33 : vector<8x128xf32>
    %35 = arith.addf %29, %34 : vector<8x128xf32>
    %cst_11 = arith.constant 0.000000e+00 : f32
    %36 = vector.broadcast %cst_11 : f32 to vector<8x128xf32>
    %37 = arith.maximumf %35, %36 : vector<8x128xf32>
    %c0_12 = arith.constant 0 : index
    %c0_13 = arith.constant 0 : index
    %38 = vector.load %arg6[%c0_12, %c0_13] : memref<1x128xf32, #tpu.memory_space<vmem>>, vector<1x128xf32>
    %39 = vector.broadcast %38 : vector<1x128xf32> to vector<8x128xf32>
    %40 = arith.mulf %37, %39 : vector<8x128xf32>
    %cst_14 = arith.constant dense<0.000000e+00> : vector<8xf32>
    %41 = vector.multi_reduction <add>, %40, %cst_14 [1] : vector<8x128xf32> to vector<8xf32>
    %42 = vector.shape_cast %41 : vector<8xf32> to vector<8x1xf32>
    %c0_15 = arith.constant 0 : index
    %c0_16 = arith.constant 0 : index
    %43 = vector.load %arg7[%c0_15, %c0_16] : memref<8x1xf32, #tpu.memory_space<vmem>>, vector<8x1xf32>
    tpu.vector_store %arg7[%c0_15, %c0_16], %42 {strides = array<i32>} : memref<8x1xf32, #tpu.memory_space<vmem>>, vector<8x1xf32>,
    return
  }
  func.func @transform_0(%arg0: i32) -> (i32, i32) {
    %c0_i32 = arith.constant 0 : i32
    %c0_i32_0 = arith.constant 0 : i32
    return %arg0, %c0_i32 : i32, i32
  }
  func.func @transform_1(%arg0: i32) -> (i32, i32) {
    %c0_i32 = arith.constant 0 : i32
    %c0_i32_0 = arith.constant 0 : i32
    %c0_i32_1 = arith.constant 0 : i32
    return %c0_i32, %c0_i32_0 : i32, i32
  }
  func.func @transform_2(%arg0: i32) -> (i32, i32) {
    %c0_i32 = arith.constant 0 : i32
    %c0_i32_0 = arith.constant 0 : i32
    return %arg0, %c0_i32 : i32, i32
  }
  func.func @transform_3(%arg0: i32) -> (i32, i32) {
    %c0_i32 = arith.constant 0 : i32
    %c0_i32_0 = arith.constant 0 : i32
    %c0_i32_1 = arith.constant 0 : i32
    return %c0_i32, %c0_i32_0 : i32, i32
  }
  func.func @transform_4(%arg0: i32) -> (i32, i32) {
    %c0_i32 = arith.constant 0 : i32
    %c0_i32_0 = arith.constant 0 : i32
    %c0_i32_1 = arith.constant 0 : i32
    return %c0_i32, %c0_i32_0 : i32, i32
  }
  func.func @transform_5(%arg0: i32) -> (i32, i32) {
    %c0_i32 = arith.constant 0 : i32
    %c0_i32_0 = arith.constant 0 : i32
    %c0_i32_1 = arith.constant 0 : i32
    return %c0_i32, %c0_i32_0 : i32, i32
  }
  func.func @transform_6(%arg0: i32) -> (i32, i32) {
    %c0_i32 = arith.constant 0 : i32
    %c0_i32_0 = arith.constant 0 : i32
    return %arg0, %c0_i32 : i32, i32
  }
}

</mosaic_0001>

<bundles_post_ra>
// kernel: tpu_custom_call.1
= control target key start
LH: loop header
LB: loop body
LE: loop exit
PB: predicated region body
PF: predicated region fallthrough
CT: control target
= control target key end

     0   :  { %s945_s21 = smov 0   ;;  %s1084_s0 = inlined_call_operand.vmem [shape: bf16[16,512], index: 0, kind: input, shape index: {}]   ;;  %s1085_s1 = inlined_call_operand.vmem [shape: bf16[512,2], index: 1, kind: input, shape index: {}]   ;;  %s1086_s2 = inlined_call_operand.vmem [shape: f32[16,1], index: 2, kind: input, shape index: {}]   ;;  %s1087_s3 = inlined_call_operand.vmem [shape: f32[1,2], index: 3, kind: input, shape index: {}]   ;;  %s1088_s4 = inlined_call_operand.vmem [shape: f32[4,128], index: 4, kind: input, shape index: {}]   ;;  %s1089_s5 = inlined_call_operand.vmem [shape: f32[1,128], index: 5, kind: input, shape index: {}]   ;;  %s1090_s6 = inlined_call_operand.vmem [shape: f32[16,1], index: 6, kind: output, shape index: {}]  }
   0x1 LB: > { %s756_s22 = sadd.s32 4294967295, %s906_s21   ;;  %p760_p0 = scmp.ge.s32.totalorder %s906_s21, 1  ;;  %s906_s21 = sphi %s945_s21, %s16_s21  }
   0x2   : > { %p221_p1 = scmp.lt.s32.totalorder %s906_s21, 3 }
   0x4   : > { %p222_p2 = pnand %p760_p0, %p221_p1 }
   0x5   : > { %v864_v0 = vld [vmem:[%s1085_s1 + $0x40] sm:$0xff] (!%p222_p2)   ;;  %v908_v3 = vmov (!%p222_p2), 0   ;;  %v868_v5 = vld [vmem:[%s1085_s1 + $0x48] sm:$0xff] (!%p222_p2)   ;;  %v872_v9 = vld [vmem:[%s1085_s1 + $0x50] sm:$0xff] (!%p222_p2)   ;;  %p254_p3 = scmp.lt.s32.totalorder (!%p222_p2), %s756_s22, 1  ;;  %v909_v40 = vmov (!%p222_p2), 1   ;;  %v642_v57 = vlaneseq (!%p222_p2) }
   0x6   : > { %225 = sbr.rel (%p222_p2) target bundleno = 545 (0x221), region = 44  ;;  %v865_v1 = vld [vmem:[%s1085_s1 + $0xc0] sm:$0xff] (!%p222_p2)   ;;  %806 = vmatprep.subr.bf16.mxu0 (!%p222_p2), %v864_v0  ;;  %860 = vset.pattern.permute.xlu0 (!%p222_p2), %v908_v3  ;;  %v869_v6 = vld [vmem:[%s1085_s1 + $0xc8] sm:$0xff] (!%p222_p2)   ;;  %v873_v10 = vld [vmem:[%s1085_s1 + $0xd0] sm:$0xff] (!%p222_p2)   ;;  %vm689_vm0 = vcmask (!%p222_p2), 7168  }
   0x7   : > { %v866_v2 = vld [vmem:[%s1085_s1] sm:$0xff] (!%p222_p2)   ;;  %828 = vmatprep.subr.bf16.mxu1 (!%p222_p2), %v865_v1  ;;  %v870_v7 = vld [vmem:[%s1085_s1 + $0x8] sm:$0xff] (!%p222_p2)   ;;  %v874_v11 = vld [vmem:[%s1085_s1 + $0x10] sm:$0xff] (!%p222_p2)   ;;  %861 = vset.pattern.permute.xlu1 (!%p222_p2), %v909_v40  ;;  %v643_v58 = vshrl.u32 (!%p222_p2), %v642_v57, 7 }
   0x8   : > { %v867_v4 = vld [vmem:[%s1085_s1 + $0x80] sm:$0xff] (!%p222_p2)   ;;  %807 = vmatpush3.bf16.msra.mxu0 (!%p222_p2), %v866_v2  ;;  %v871_v8 = vld [vmem:[%s1085_s1 + $0x88] sm:$0xff] (!%p222_p2)   ;;  %v875_v12 = vld [vmem:[%s1085_s1 + $0x90] sm:$0xff] (!%p222_p2)  }
   0x9   : > { %829 = vmatpush3.bf16.msra.mxu1 (!%p222_p2), %v867_v4  ;;  %808 = vmatprep.subr.bf16.mxu0 (!%p222_p2), %v868_v5  ;;  %v876_v13 = vld [vmem:[%s1085_s1 + $0x58] sm:$0xff] (!%p222_p2)   ;;  %v880_v17 = vld [vmem:[%s1085_s1 + $0x60] sm:$0xff] (!%p222_p2)   ;;  %v884_v21 = vld [vmem:[%s1085_s1 + $0x68] sm:$0xff] (!%p222_p2)   ;;  %v653_v59 = vsub.s32 (!%p222_p2), 1, %v643_v58  ;;  %v644_v60 = vsub.s32 (!%p222_p2), 0, %v643_v58  ;;  %v664_v0 = vsub.s32 (!%p222_p2), 2, %v643_v58 }
   0xa   : > { %830 = vmatprep.subr.bf16.mxu1 (!%p222_p2), %v869_v6  ;;  %v877_v14 = vld [vmem:[%s1085_s1 + $0xd8] sm:$0xff] (!%p222_p2)   ;;  %v881_v18 = vld [vmem:[%s1085_s1 + $0xe0] sm:$0xff] (!%p222_p2)   ;;  %v885_v22 = vld [vmem:[%s1085_s1 + $0xe8] sm:$0xff] (!%p222_p2)   ;;  %v674_v4 = vsub.s32 (!%p222_p2), 3, %v643_v58 }
   0xb   : > { %v878_v15 = vld [vmem:[%s1085_s1 + $0x18] sm:$0xff] (!%p222_p2)   ;;  %v882_v19 = vld [vmem:[%s1085_s1 + $0x20] sm:$0xff] (!%p222_p2)   ;;  %v886_v23 = vld [vmem:[%s1085_s1 + $0x28] sm:$0xff] (!%p222_p2)  }
   0xc   : > { %809 = vmatpush3.bf16.msra.mxu0 (!%p222_p2), %v870_v7  ;;  %v879_v16 = vld [vmem:[%s1085_s1 + $0x98] sm:$0xff] (!%p222_p2)   ;;  %v883_v20 = vld [vmem:[%s1085_s1 + $0xa0] sm:$0xff] (!%p222_p2)   ;;  %v887_v24 = vld [vmem:[%s1085_s1 + $0xa8] sm:$0xff] (!%p222_p2)  }
   0xd   : > { %831 = vmatpush3.bf16.msra.mxu1 %v871_v8  ;;  %810 = vmatprep.subr.bf16.mxu0 %v872_v9  ;;  %s1092_s22 = smov (!%p254_p3, %s756_s22), 1  ;;  %v888_v25 = vld [vmem:[%s1085_s1 + $0x70] sm:$0xff]   ;;  %v892_v29 = vld [vmem:[%s1085_s1 + $0x78] sm:$0xff]   ;;  %v801_v50 = vld [vmem:[%s1087_s3] ss:$0 sm:$0xff] }
   0xe   : > { %832 = vmatprep.subr.bf16.mxu1 %v873_v10  ;;  %v889_v26 = vld [vmem:[%s1085_s1 + $0xf0] sm:$0xff]   ;;  %s805_s7 = sshll.u32 %s1092_s22, 4  ;;  %s763_s10 = sshll.u32 %s1092_s22, 3  ;;  %v893_v30 = vld [vmem:[%s1085_s1 + $0xf8] sm:$0xff]   ;;  %v636_v61 = vld [vmem:[%s1088_s4] sm:$0xf] }
   0xf   : > { %v890_v27 = vld [vmem:[%s1085_s1 + $0x30] sm:$0xff]   ;;  %s258_s19 = scalar_lea.vmem %s1084_s0, %s805_s7  ;;  %s262_s24 = scalar_lea.vmem %s1086_s2, %s763_s10  ;;  %v894_v31 = vld [vmem:[%s1085_s1 + $0x38] sm:$0xff]   ;;  %v654_v62 = vrot.slane %v636_v61, %v653_v59  ;;  %v645_v63 = vrot.slane %v636_v61, %v644_v60  ;;  %v665_v6 = vrot.slane %v636_v61, %v664_v0  ;;  %v675_v7 = vrot.slane %v636_v61, %v674_v4 }
  0x10   : > { %811 = vmatpush3.bf16.msra.mxu0 %v874_v11  ;;  %v891_v28 = vld [vmem:[%s1085_s1 + $0xb0] sm:$0xff]   ;;  %v895_v32 = vld [vmem:[%s1085_s1 + $0xb8] sm:$0xff]   ;;  %v268_v33 = vld [vmem:[%s258_s19] sm:$0xff]  ;;  %s266_s14 = scalar_lea.vmem %s1090_s6, %s763_s10 }
  0x11   : > { %833 = vmatpush3.bf16.msra.mxu1 %v875_v12  ;;  %812 = vmatprep.subr.bf16.mxu0 %v876_v13  ;;  %v269_v34 = vld [vmem:[%s258_s19 + $0x8] sm:$0xff]  ;;  %v621_v35 = vld [vmem:[%s262_s24] sm:$0xff]  ;;  %v765_v36 = vcombine.low %v268_v33, %v268_v33  ;;  %v766_v37 = vcombine.high %v268_v33, %v268_v33 }
  0x12   : > { %834 = vmatprep.subr.bf16.mxu1 %v877_v14  ;;  %v767_v38 = vcombine.low %v269_v34, %v269_v34  ;;  %v768_v39 = vcombine.high %v269_v34, %v269_v34  ;;  %625 = vperm.xlu0 %860, %v621_v35  }
  0x13   : > { %572 = vmatprep.mubr.bf16.mxu0 %v766_v37 }
  0x14   : > { %813 = vmatpush3.bf16.msra.mxu0 %v878_v15  ;;  %612 = vmatprep.mubr.bf16.mxu1 %v768_v39  ;;  %v802_v15 = vld [vmem:[%s1089_s5] ss:$0 sm:$0xff] }
  0x15   : > { %835 = vmatpush3.bf16.msra.mxu1 %v879_v16  ;;  %814 = vmatprep.subr.bf16.mxu0 %v880_v17 }
  0x16   : > { %836 = vmatprep.subr.bf16.mxu1 %v881_v18 }
  0x18   : > { %815 = vmatpush3.bf16.msra.mxu0 %v882_v19 }
  0x19   : > { %837 = vmatpush3.bf16.msra.mxu1 %v883_v20  ;;  %816 = vmatprep.subr.bf16.mxu0 %v884_v21 }
  0x1a   : > { %838 = vmatprep.subr.bf16.mxu1 %v885_v22 }
  0x1c   : > { %817 = vmatpush3.bf16.msra.mxu0 %v886_v23 }
  0x1d   : > { %839 = vmatpush3.bf16.msra.mxu1 %v887_v24  ;;  %818 = vmatprep.subr.bf16.mxu0 %v888_v25 }
  0x1e   : > { %840 = vmatprep.subr.bf16.mxu1 %v889_v26 }
  0x20   : > { %819 = vmatpush3.bf16.msra.mxu0 %v890_v27 }
  0x21   : > { %841 = vmatpush3.bf16.msra.mxu1 %v891_v28  ;;  %820 = vmatprep.subr.bf16.mxu0 %v892_v29 }
  0x22   : > { %842 = vmatprep.subr.bf16.mxu1 %v893_v30 }
  0x24   : > { %821 = vmatpush3.bf16.msra.mxu0 %v894_v31 }
  0x25   : > { %843 = vmatpush3.bf16.msra.mxu1 %v895_v32 }
  0x27   : > { %573 = vmatmul.mubr.bf16.vlgmr.msra.gmra.mrb[0].mxu0 %v765_v36 }
  0x28   : > { %613 = vmatmul.mubr.bf16.vlgmr.msra.gmra.mrb[0].mxu1 %v767_v38 }
  0x91   : > { %v626_v41 = vpop.permute.xlu0 %625 }
  0x92   : > { %v634_v54 = vmul.f32 %v801_v50, %v626_v41 }
  0x94   : > { %v635_v56 = vmax.f32 %v634_v54, 0.0 }
  0xfa   : > { %v822_v42 = vpop.f32.mrb[0].mxu0 }
  0xfb   : > { %v844_v43 = vpop.f32.mrb[0].mxu1  ;;  %v823_v44 = vpop.f32.mrb[1].mxu0 }
  0xfc   : > { %v845_v45 = vpop.f32.mrb[1].mxu1  ;;  %v824_v46 = vadd.f32 %v823_v44, %v822_v42  ;;  %v825_v48 = vpop.f32.mrb[2].mxu0 }
  0xfd   : > { %v846_v47 = vadd.f32 %v845_v45, %v844_v43  ;;  %v847_v49 = vpop.f32.mrb[2].mxu1  ;;  %v826_v51 = vpop.f32.mrb[3].mxu0 }
  0xfe   : > { %v848_v52 = vpop.f32.mrb[3].mxu1 }
  0xff   : > { %v615_v53 = vadd.f32 %v846_v47, %v824_v46 }
 0x101   : > { %v620_v55 = vmax.f32 %v615_v53, 0.0 }
 0x103   : > { %648 = vperm.xlu1 %861, %v620_v55   ;;  %639 = vperm.xlu0 %860, %v620_v55  }
 0x107   : > { %862 = vset.pattern.permute.xlu1 %v908_v3  ;;  %863 = vset.pattern.permute.xlu0 %v909_v40 }
 0x108   : > { %659 = vperm.xlu1 %862, %v635_v56   ;;  %669 = vperm.xlu0 %863, %v635_v56  }
 0x182   : > { %v649_v1 = vpop.permute.xlu1 %648  ;;  %v640_v2 = vpop.permute.xlu0 %639 }
 0x183   : > { %v655_v5 = vmul.f32 %v654_v62, %v649_v1  ;;  %v646_v3 = vmul.f32 %v645_v63, %v640_v2 }
 0x185   : > { %v656_v10 = vadd.f32 %v655_v5, %v646_v3 }
 0x187   : > { %v660_v8 = vpop.permute.xlu1 %659  ;;  %v670_v9 = vpop.permute.xlu0 %669 }
 0x188   : > { %v666_v11 = vmul.f32 %v665_v6, %v660_v8  ;;  %v676_v13 = vmul.f32 %v675_v7, %v670_v9 }
 0x18a   : > { %v667_v12 = vadd.f32 %v666_v11, %v656_v10 }
 0x18c   : > { %v677_v14 = vadd.f32 %v676_v13, %v667_v12 }
 0x18e   : > { %v678_v16 = vmax.f32 %v677_v14, 0.0 }
 0x190   : > { %v686_v17 = vmul.f32 %v802_v15, %v678_v16 }
 0x192   : > { %687 = vadd.xlane.f32.xlu1 %v686_v17 }
 0x21f   : > { %v688_v18 = vpop.xlane.xlu1 %687 }
 0x220   : > { %690 = vst.msk [vmem:[%s266_s14] sm:$0xff] %vm689_vm0, %v688_v18 }
 0x221 PF: > { %s16_s21 = sadd.s32 1, %s906_s21  }
 0x222   : > { %p13_p4 = scmp.ge.s32.totalorder %s16_s21, 4  }
 0x224   :  { %15 = sbr.rel (!%p13_p4) target bundleno = 1 (0x1), region = 77 }

</bundles_post_ra>
